<compile_context>
chip_gen: v5e
topology: v5e:2x2
jax: 0.10.0
libtpu: 0.0.40
codegen_flags: <defaults>
</compile_context>

<pallas_src>
import jax
import jax.numpy as jnp
from jax.experimental import pallas as pl
from jax.experimental.pallas import tpu as pltpu

# PROControl hyper-parameters (defaults of the reference module).
DT = 0.1
BETA = 0.1
LAMBDA_DECAY = 0.95
PSI = 0.1
PHI = 0.1
RHO = 0.1
SIGMA = 0.1
RESPONSE_THRESHOLD = 0.5


def her_step_kernel(step_ref, wsc_ref, ubig_ref, wf_ref, react_ref, stin_ref,
                    out_ref, st_ref):
    """One HER forward step (all layers) per grid iteration.

    step_ref  : (1, 1+L, N)   rows: [stimuli, noise_layer0, ..., noise_layer{L-1}]
    wsc_ref   : (L, N, 2N)    [W_S^T | W_C] per layer   (x @ wsc -> [ro | direct_e])
    ubig_ref  : (L, D*N, N)   U permuted/reshaped so tp = delay_chain_row @ ubig
    wf_ref    : (L, N, N)     W_F per layer             (rowf = ro @ W_F)
    react_ref : (L, 2, N)     rows: [sum relu(-W_R), sum relu(W_R)]  (hoisted constants)
    stin_ref  : (L, 3, D*N)   initial state rows: [delay_chain, eligibility_trace, C(pad)]
    out_ref   : (1, 1, L*4*N) packed per-step outputs (per layer: [C, ro, tp, disc])
    st_ref    : (L, 3, D*N)   carried state (same layout as stin_ref); VMEM-resident across
                              the whole grid, written back to HBM once at the end.
    """
    t = pl.program_id(0)
    n_layers = wsc_ref.shape[0]
    n = wf_ref.shape[1]
    dn = ubig_ref.shape[1]            # D * N, lane-major delay-chain row width

    # Load the initial state into the carried (grid-resident) output buffer once.
    @pl.when(t == 0)
    def _():
        st_ref[...] = stin_ref[...]

    x = step_ref[0, 0:1, :]                            # (1, N) layer-0 stimuli
    rows = []
    for l in range(n_layers):                          # static unroll: ro chain stays in vregs
        # Old state (all reads before any write for this layer).
        dc_old = st_ref[l, 0:1, :]                     # (1, D*N) delay chain, lane-major
        et_old = st_ref[l, 1:2, :]                     # (1, D*N) eligibility trace
        c_old = st_ref[l, 2:3, 0:n]                    # (1, N)   response activation C

        # --- R-O prediction + direct excitation: ONE MXU push on the serial chain ---
        big = jnp.dot(x, wsc_ref[l], preferred_element_type=jnp.float32)   # (1, 2N)
        ro = big[:, 0:n]                               # x @ W_S^T
        direct_e = big[:, n:2 * n]                     # x @ W_C

        # --- delay chain roll+insert and eligibility trace (single lane-dense rows) ---
        dc_new = jnp.concatenate([x, dc_old[:, 0:dn - n]], axis=1)         # (1, D*N)
        et_new = dc_new + LAMBDA_DECAY * et_old
        st_ref[l, 0:1, :] = dc_new
        st_ref[l, 1:2, :] = et_new
        # TODO(synk): the reference print()s delay_chain / eligibility_trace here; omitted.

        # --- temporal prediction: whole delay chain in ONE matmul ---
        tp = jnp.dot(dc_new, ubig_ref[l], preferred_element_type=jnp.float32)  # (1, N)

        # --- excitation / inhibition ---
        rowf = jnp.dot(ro, wf_ref[l], preferred_element_type=jnp.float32)  # shared W_F product
        react_e = react_ref[l, 0:1, :]
        react_i = react_ref[l, 1:2, :]
        noise = step_ref[0, 1 + l:2 + l, :]

        excitation = RHO * (direct_e + jnp.maximum(-rowf, 0.0) + react_e)
        # W_I is the reference's fixed -identity buffer, so psi * (x @ W_I) == -psi * x.
        inhibition = -PSI * x + PHI * (jnp.maximum(rowf, 0.0) + react_i)

        # --- response activation (eqs. 5-7) ---
        delta_c = BETA * DT * (excitation * (1.0 - c_old)
                               - (c_old + 0.05) * (inhibition + 1.0) + noise)
        c_new = jnp.clip(c_old + delta_c, 0.0, 1.0)
        disc = (c_new > RESPONSE_THRESHOLD).astype(jnp.float32)
        st_ref[l, 2:3, 0:n] = c_new

        rows.append(jnp.concatenate([c_new, ro, tp, disc], axis=1))        # (1, 4N)
        x = ro    # HER chaining: next layer's stimuli are this layer's ro_predictions

    # One lane-dense store per step for all per-layer outputs.
    out_ref[0, 0:1, :] = jnp.concatenate(rows, axis=1)                     # (1, L*4N)


def _her_impl(stimuli_seq, noise_seq, wsc, ubig, wf, react, state):
    t_steps = stimuli_seq.shape[0]
    n_layers, n, _ = wsc.shape
    dn = ubig.shape[1]

    # Per-step slab: row 0 = stimuli, rows 1..L = per-layer noise (one DMA per step).
    step_in = jnp.concatenate([stimuli_seq, noise_seq], axis=1)            # (T, 1+L, N)

    def full_spec(shape):
        # Full-array block, constant index -> DMA'd exactly once for the whole grid.
        return pl.BlockSpec(shape, lambda t, _s=shape: (0,) * len(_s))

    out_seq, state_new = pl.pallas_call(
        her_step_kernel,
        grid=(t_steps,),
        in_specs=[
            pl.BlockSpec((1, 1 + n_layers, n), lambda t: (t, 0, 0)),       # per-step slab
            full_spec((n_layers, n, 2 * n)),                               # [W_S^T | W_C]
            full_spec((n_layers, dn, n)),                                  # U (flattened)
            full_spec((n_layers, n, n)),                                   # W_F
            full_spec((n_layers, 2, n)),                                   # react_e/react_i
            full_spec((n_layers, 3, dn)),                                  # initial state
        ],
        out_specs=(
            pl.BlockSpec((1, 1, n_layers * 4 * n), lambda t: (t, 0, 0)),   # per-step outputs
            full_spec((n_layers, 3, dn)),                                  # final state
        ),
        out_shape=(
            jax.ShapeDtypeStruct((t_steps, 1, n_layers * 4 * n), jnp.float32),
            jax.ShapeDtypeStruct((n_layers, 3, dn), jnp.float32),
        ),
        input_output_aliases={5: 1},     # state slab is updated in place (no extra copy)
        compiler_params=pltpu.CompilerParams(dimension_semantics=("arbitrary",)),
    )(step_in, wsc, ubig, wf, react, state)

    return out_seq.reshape(t_steps, n_layers, 4, n), state_new


_her_impl_jit = jax.jit(_her_impl, donate_argnums=(6,))


def her_forward_sequence(stimuli_seq, params, state, noise_seq):
    """Run T consecutive HERModel.forward steps in one kernel launch.

    Returns (outputs (T, L, 4, N) with rows [response, ro, tp, disc], new_state_slab).
    """
    return _her_impl_jit(stimuli_seq, noise_seq, params["WSC"], params["U_BIG"],
                         params["W_F"], params["REACT"], state)


def her_forward(stimuli, params, state, noise):
    """Single HERModel.forward: returns (layer_outputs, layer_responses, new_state)."""
    out, state_new = her_forward_sequence(stimuli[None], params, state, noise[None])
    out0 = out[0]                                       # (L, 4, N)
    n_layers = out0.shape[0]
    layer_outputs = [(out0[l, 0:1], out0[l, 1:2], out0[l, 2:3], out0[l, 3:4])
                     for l in range(n_layers)]
    layer_responses = [out0[l, 3:4] for l in range(n_layers)]
    return layer_outputs, layer_responses, state_new


def init_her_params(key, n_layers, n, n_delay):
    """Stacked per-layer parameters mirroring PROControl.__init__ (n_outcomes == 1)."""
    wsc_l, ubig_l, wf_l, react_l = [], [], [], []
    for k in jax.random.split(key, n_layers):
        k_ws, k_wf = jax.random.split(k)
        w_s = jnp.abs(0.1 + 0.05 * jax.random.normal(k_ws, (n, n), jnp.float32))
        w_c = jnp.ones((n, n), jnp.float32)
        w_f = 0.1 * jax.random.normal(k_wf, (n, n), jnp.float32)
        norm = jnp.sum(jnp.abs(w_f)) / n                # n_responses * n_outcomes == n
        w_f = jnp.where(norm > 1.0, w_f / norm, w_f)
        w_r = jnp.zeros((n, n), jnp.float32)
        u = jnp.zeros((n, n_delay, n), jnp.float32)     # (n_ro, delay, stim)
        # Fused [W_S^T | W_C] so ro and the direct excitation come from one matmul.
        wsc_l.append(jnp.concatenate([jnp.transpose(w_s), w_c], axis=1))   # (N, 2N)
        # U permuted to (delay, stim, ro) and flattened so tp = dc_row @ U_big.
        ubig_l.append(jnp.transpose(u, (1, 2, 0)).reshape(n_delay * n, n))
        wf_l.append(w_f)
        # Reactive terms depend only on W_R -> hoisted out of the kernel (pre-packed).
        react_l.append(jnp.stack([jnp.sum(jnp.maximum(-w_r, 0.0), axis=1),
                                  jnp.sum(jnp.maximum(w_r, 0.0), axis=1)]))
        # W_I (fixed -identity buffer) is folded into the kernel as -PSI * x.
    return {"WSC": jnp.stack(wsc_l), "U_BIG": jnp.stack(ubig_l),
            "W_F": jnp.stack(wf_l), "REACT": jnp.stack(react_l)}


def init_her_state(n_layers, n, n_delay):
    """State slab: per layer rows [delay_chain (D*N), eligibility_trace (D*N), C (pad)]."""
    return jnp.zeros((n_layers, 3, n_delay * n), jnp.float32)


if __name__ == "__main__":
    # Only shape-consistent configuration of the reference module:
    # n_outcomes == 1 and n_stimuli == n_responses == n_ro_conjunctions == N.
    N = 8            # n_stimuli == n_responses == n_ro_conjunctions
    D = 4            # n_delay_units
    N_LAYERS = 3
    T = 8            # forward steps fused into one kernel launch

    key = jax.random.PRNGKey(0)
    key, k_par, k_stim, k_noise = jax.random.split(key, 4)
    params = init_her_params(k_par, N_LAYERS, N, D)
    state = init_her_state(N_LAYERS, N, D)

    # T consecutive forward calls (fresh normal(0, sigma) noise per step, as torch.normal).
    stimuli_seq = jax.random.normal(k_stim, (T, 1, N), jnp.float32)
    noise_seq = SIGMA * jax.random.normal(k_noise, (T, N_LAYERS, N), jnp.float32)
    outputs, state = her_forward_sequence(stimuli_seq, params, state, noise_seq)
    jax.block_until_ready((outputs, state))

    # Single-step API (reference HERModel.forward signature), reusing the same kernel.
    key, k_s1, k_n1 = jax.random.split(key, 3)
    stim1 = jax.random.normal(k_s1, (1, N), jnp.float32)
    noise1 = SIGMA * jax.random.normal(k_n1, (N_LAYERS, N), jnp.float32)
    layer_outputs, layer_responses, state = her_forward(stim1, params, state, noise1)
    jax.block_until_ready((layer_outputs, layer_responses, state))

    print("KERNEL_OK")
</pallas_src>

<mosaic_0001>
module attributes {stable_mosaic.version = 11 : i64} {
  func.func @her_step_kernel(%arg0: i32, %arg1: memref<1x4x8xf32, #tpu.memory_space<vmem>>, %arg2: memref<3x8x16xf32, #tpu.memory_space<vmem>>, %arg3: memref<3x32x8xf32, #tpu.memory_space<vmem>>, %arg4: memref<3x8x8xf32, #tpu.memory_space<vmem>>, %arg5: memref<3x2x8xf32, #tpu.memory_space<vmem>>, %arg6: memref<3x3x32xf32, #tpu.memory_space<vmem>>, %arg7: memref<1x1x96xf32, #tpu.memory_space<vmem>>, %arg8: memref<3x3x32xf32, #tpu.memory_space<vmem>>) attributes {dimension_semantics = [#tpu.dimension_semantics<arbitrary>], iteration_bounds = array<i64: 8>, scalar_prefetch = 0 : i64, scratch_operands = 0 : i64, tpu.core_type = #tpu.core_type<tc>, window_params = [{transform_indices = @transform_0, window_bounds = array<i64: 1, 4, 8>}, {pipeline_mode = #tpu.pipeline_mode<synchronous>, transform_indices = @transform_1, window_bounds = array<i64: 3, 8, 16>}, {pipeline_mode = #tpu.pipeline_mode<synchronous>, transform_indices = @transform_2, window_bounds = array<i64: 3, 32, 8>}, {pipeline_mode = #tpu.pipeline_mode<synchronous>, transform_indices = @transform_3, window_bounds = array<i64: 3, 8, 8>}, {pipeline_mode = #tpu.pipeline_mode<synchronous>, transform_indices = @transform_4, window_bounds = array<i64: 3, 2, 8>}, {pipeline_mode = #tpu.pipeline_mode<synchronous>, transform_indices = @transform_5, window_bounds = array<i64: 3, 3, 32>}, {transform_indices = @transform_6, window_bounds = array<i64: 1, 1, 96>}, {pipeline_mode = #tpu.pipeline_mode<synchronous>, transform_indices = @transform_7, window_bounds = array<i64: 3, 3, 32>}]} {
    %c0_i32 = arith.constant 0 : i32
    %0 = arith.cmpi eq, %arg0, %c0_i32 : i32
    %1 = arith.extui %0 : i1 to i32
    %c0_i32_0 = arith.constant 0 : i32
    %2 = arith.cmpi ne, %1, %c0_i32_0 : i32
    scf.if %2 {
      %c0_161 = arith.constant 0 : index
      %c0_162 = arith.constant 0 : index
      %c0_163 = arith.constant 0 : index
      %234 = vector.load %arg6[%c0_161, %c0_162, %c0_163] : memref<3x3x32xf32, #tpu.memory_space<vmem>>, vector<3x3x32xf32>
      %c0_164 = arith.constant 0 : index
      %c0_165 = arith.constant 0 : index
      %c0_166 = arith.constant 0 : index
      %235 = vector.load %arg8[%c0_164, %c0_165, %c0_166] : memref<3x3x32xf32, #tpu.memory_space<vmem>>, vector<3x3x32xf32>
      tpu.vector_store %arg8[%c0_164, %c0_165, %c0_166], %234 {strides = array<i32>} : memref<3x3x32xf32, #tpu.memory_space<vmem>>, vector<3x3x32xf32>,
    } else {
    }
    %c0 = arith.constant 0 : index
    %c0_1 = arith.constant 0 : index
    %c0_2 = arith.constant 0 : index
    %3 = vector.load %arg1[%c0, %c0_1, %c0_2] : memref<1x4x8xf32, #tpu.memory_space<vmem>>, vector<1x1x8xf32>
    %4 = vector.shape_cast %3 : vector<1x1x8xf32> to vector<1x8xf32>
    %c0_3 = arith.constant 0 : index
    %c0_4 = arith.constant 0 : index
    %c0_5 = arith.constant 0 : index
    %5 = vector.load %arg8[%c0_3, %c0_4, %c0_5] : memref<3x3x32xf32, #tpu.memory_space<vmem>>, vector<1x1x32xf32>
    %6 = vector.shape_cast %5 : vector<1x1x32xf32> to vector<1x32xf32>
    %c0_6 = arith.constant 0 : index
    %c1 = arith.constant 1 : index
    %c0_7 = arith.constant 0 : index
    %7 = vector.load %arg8[%c0_6, %c1, %c0_7] : memref<3x3x32xf32, #tpu.memory_space<vmem>>, vector<1x1x32xf32>
    %8 = vector.shape_cast %7 : vector<1x1x32xf32> to vector<1x32xf32>
    %c0_8 = arith.constant 0 : index
    %c2 = arith.constant 2 : index
    %c0_9 = arith.constant 0 : index
    %9 = vector.load %arg8[%c0_8, %c2, %c0_9] : memref<3x3x32xf32, #tpu.memory_space<vmem>>, vector<1x1x8xf32>
    %10 = vector.shape_cast %9 : vector<1x1x8xf32> to vector<1x8xf32>
    %c0_10 = arith.constant 0 : index
    %c0_11 = arith.constant 0 : index
    %c0_12 = arith.constant 0 : index
    %11 = vector.load %arg2[%c0_10, %c0_11, %c0_12] : memref<3x8x16xf32, #tpu.memory_space<vmem>>, vector<1x8x16xf32>
    %12 = vector.shape_cast %11 : vector<1x8x16xf32> to vector<8x16xf32>
    %cst = arith.constant dense<0.000000e+00> : vector<1x16xf32>
    %13 = tpu.matmul %4, %12, %cst {dimension_numbers = #tpu.dot_dimension_numbers<[1], [0], [0], [1], [0, 0, 1, 1], [], []>} : vector<1x8xf32>, vector<8x16xf32>, vector<1x16xf32> -> vector<1x16xf32>
    %14 = vector.extract_strided_slice %13 {offsets = [0, 0], sizes = [1, 8], strides = [1, 1]} : vector<1x16xf32> to vector<1x8xf32>
    %15 = vector.extract_strided_slice %13 {offsets = [0, 8], sizes = [1, 8], strides = [1, 1]} : vector<1x16xf32> to vector<1x8xf32>
    %16 = vector.extract_strided_slice %6 {offsets = [0, 0], sizes = [1, 24], strides = [1, 1]} : vector<1x32xf32> to vector<1x24xf32>
    %17 = tpu.concatenate %4, %16 in 1 : vector<1x8xf32>, vector<1x24xf32> -> vector<1x32xf32>
    %cst_13 = arith.constant 0.949999988 : f32
    %18 = vector.broadcast %cst_13 : f32 to vector<1x32xf32>
    %19 = arith.mulf %18, %8 : vector<1x32xf32>
    %20 = arith.addf %17, %19 : vector<1x32xf32>
    %c0_14 = arith.constant 0 : index
    %c0_15 = arith.constant 0 : index
    %c0_16 = arith.constant 0 : index
    %21 = vector.load %arg8[%c0_14, %c0_15, %c0_16] : memref<3x3x32xf32, #tpu.memory_space<vmem>>, vector<1x1x32xf32>
    %22 = vector.shape_cast %21 : vector<1x1x32xf32> to vector<1x32xf32>
    %23 = vector.shape_cast %17 : vector<1x32xf32> to vector<1x1x32xf32>
    tpu.vector_store %arg8[%c0_14, %c0_15, %c0_16], %23 {strides = array<i32>} : memref<3x3x32xf32, #tpu.memory_space<vmem>>, vector<1x1x32xf32>,
    %c0_17 = arith.constant 0 : index
    %c1_18 = arith.constant 1 : index
    %c0_19 = arith.constant 0 : index
    %24 = vector.load %arg8[%c0_17, %c1_18, %c0_19] : memref<3x3x32xf32, #tpu.memory_space<vmem>>, vector<1x1x32xf32>
    %25 = vector.shape_cast %24 : vector<1x1x32xf32> to vector<1x32xf32>
    %26 = vector.shape_cast %20 : vector<1x32xf32> to vector<1x1x32xf32>
    tpu.vector_store %arg8[%c0_17, %c1_18, %c0_19], %26 {strides = array<i32>} : memref<3x3x32xf32, #tpu.memory_space<vmem>>, vector<1x1x32xf32>,
    %c0_20 = arith.constant 0 : index
    %c0_21 = arith.constant 0 : index
    %c0_22 = arith.constant 0 : index
    %27 = vector.load %arg3[%c0_20, %c0_21, %c0_22] : memref<3x32x8xf32, #tpu.memory_space<vmem>>, vector<1x32x8xf32>
    %28 = vector.shape_cast %27 : vector<1x32x8xf32> to vector<32x8xf32>
    %cst_23 = arith.constant dense<0.000000e+00> : vector<1x8xf32>
    %29 = tpu.matmul %17, %28, %cst_23 {dimension_numbers = #tpu.dot_dimension_numbers<[1], [0], [0], [1], [0, 0, 1, 1], [], []>} : vector<1x32xf32>, vector<32x8xf32>, vector<1x8xf32> -> vector<1x8xf32>
    %c0_24 = arith.constant 0 : index
    %c0_25 = arith.constant 0 : index
    %c0_26 = arith.constant 0 : index
    %30 = vector.load %arg4[%c0_24, %c0_25, %c0_26] : memref<3x8x8xf32, #tpu.memory_space<vmem>>, vector<1x8x8xf32>
    %31 = vector.shape_cast %30 : vector<1x8x8xf32> to vector<8x8xf32>
    %cst_27 = arith.constant dense<0.000000e+00> : vector<1x8xf32>
    %32 = tpu.matmul %14, %31, %cst_27 {dimension_numbers = #tpu.dot_dimension_numbers<[1], [0], [0], [1], [0, 0, 1, 1], [], []>} : vector<1x8xf32>, vector<8x8xf32>, vector<1x8xf32> -> vector<1x8xf32>
    %c0_28 = arith.constant 0 : index
    %c0_29 = arith.constant 0 : index
    %c0_30 = arith.constant 0 : index
    %33 = vector.load %arg5[%c0_28, %c0_29, %c0_30] : memref<3x2x8xf32, #tpu.memory_space<vmem>>, vector<1x1x8xf32>
    %34 = vector.shape_cast %33 : vector<1x1x8xf32> to vector<1x8xf32>
    %c0_31 = arith.constant 0 : index
    %c1_32 = arith.constant 1 : index
    %c0_33 = arith.constant 0 : index
    %35 = vector.load %arg5[%c0_31, %c1_32, %c0_33] : memref<3x2x8xf32, #tpu.memory_space<vmem>>, vector<1x1x8xf32>
    %36 = vector.shape_cast %35 : vector<1x1x8xf32> to vector<1x8xf32>
    %c0_34 = arith.constant 0 : index
    %c1_35 = arith.constant 1 : index
    %c0_36 = arith.constant 0 : index
    %37 = vector.load %arg1[%c0_34, %c1_35, %c0_36] : memref<1x4x8xf32, #tpu.memory_space<vmem>>, vector<1x1x8xf32>
    %38 = vector.shape_cast %37 : vector<1x1x8xf32> to vector<1x8xf32>
    %cst_37 = arith.constant 0.000000e+00 : f32
    %39 = vector.broadcast %cst_37 : f32 to vector<1x8xf32>
    %40 = arith.subf %39, %32 : vector<1x8xf32>
    %cst_38 = arith.constant 0.000000e+00 : f32
    %41 = vector.broadcast %cst_38 : f32 to vector<1x8xf32>
    %42 = arith.maximumf %40, %41 : vector<1x8xf32>
    %43 = arith.addf %15, %42 : vector<1x8xf32>
    %44 = arith.addf %43, %34 : vector<1x8xf32>
    %cst_39 = arith.constant 1.000000e-01 : f32
    %45 = vector.broadcast %cst_39 : f32 to vector<1x8xf32>
    %46 = arith.mulf %45, %44 : vector<1x8xf32>
    %cst_40 = arith.constant -1.000000e-01 : f32
    %47 = vector.broadcast %cst_40 : f32 to vector<1x8xf32>
    %48 = arith.mulf %47, %4 : vector<1x8xf32>
    %cst_41 = arith.constant 0.000000e+00 : f32
    %49 = vector.broadcast %cst_41 : f32 to vector<1x8xf32>
    %50 = arith.maximumf %32, %49 : vector<1x8xf32>
    %51 = arith.addf %50, %36 : vector<1x8xf32>
    %cst_42 = arith.constant 1.000000e-01 : f32
    %52 = vector.broadcast %cst_42 : f32 to vector<1x8xf32>
    %53 = arith.mulf %52, %51 : vector<1x8xf32>
    %54 = arith.addf %48, %53 : vector<1x8xf32>
    %cst_43 = arith.constant 1.000000e+00 : f32
    %55 = vector.broadcast %cst_43 : f32 to vector<1x8xf32>
    %56 = arith.subf %55, %10 : vector<1x8xf32>
    %57 = arith.mulf %46, %56 : vector<1x8xf32>
    %cst_44 = arith.constant 5.000000e-02 : f32
    %58 = vector.broadcast %cst_44 : f32 to vector<1x8xf32>
    %59 = arith.addf %10, %58 : vector<1x8xf32>
    %cst_45 = arith.constant 1.000000e+00 : f32
    %60 = vector.broadcast %cst_45 : f32 to vector<1x8xf32>
    %61 = arith.addf %54, %60 : vector<1x8xf32>
    %62 = arith.mulf %59, %61 : vector<1x8xf32>
    %63 = arith.subf %57, %62 : vector<1x8xf32>
    %64 = arith.addf %63, %38 : vector<1x8xf32>
    %cst_46 = arith.constant 0.00999999977 : f32
    %65 = vector.broadcast %cst_46 : f32 to vector<1x8xf32>
    %66 = arith.mulf %65, %64 : vector<1x8xf32>
    %67 = arith.addf %10, %66 : vector<1x8xf32>
    %cst_47 = arith.constant 0.000000e+00 : f32
    %cst_48 = arith.constant 1.000000e+00 : f32
    %68 = vector.broadcast %cst_47 : f32 to vector<1x8xf32>
    %69 = arith.maximumf %68, %67 : vector<1x8xf32>
    %70 = vector.broadcast %cst_48 : f32 to vector<1x8xf32>
    %71 = arith.minimumf %70, %69 : vector<1x8xf32>
    %cst_49 = arith.constant 5.000000e-01 : f32
    %72 = vector.broadcast %cst_49 : f32 to vector<1x8xf32>
    %73 = arith.cmpf ogt, %71, %72 : vector<1x8xf32>
    %74 = arith.extui %73 : vector<1x8xi1> to vector<1x8xi32>
    %75 = arith.sitofp %74 : vector<1x8xi32> to vector<1x8xf32>
    %c0_50 = arith.constant 0 : index
    %c2_51 = arith.constant 2 : index
    %c0_52 = arith.constant 0 : index
    %76 = vector.load %arg8[%c0_50, %c2_51, %c0_52] : memref<3x3x32xf32, #tpu.memory_space<vmem>>, vector<1x1x8xf32>
    %77 = vector.shape_cast %76 : vector<1x1x8xf32> to vector<1x8xf32>
    %78 = vector.shape_cast %71 : vector<1x8xf32> to vector<1x1x8xf32>
    tpu.vector_store %arg8[%c0_50, %c2_51, %c0_52], %78 {strides = array<i32>} : memref<3x3x32xf32, #tpu.memory_space<vmem>>, vector<1x1x8xf32>,
    %79 = tpu.concatenate %71, %14, %29, %75 in 1 : vector<1x8xf32>, vector<1x8xf32>, vector<1x8xf32>, vector<1x8xf32> -> vector<1x32xf32>
    %c1_53 = arith.constant 1 : index
    %c0_54 = arith.constant 0 : index
    %c0_55 = arith.constant 0 : index
    %80 = vector.load %arg8[%c1_53, %c0_54, %c0_55] : memref<3x3x32xf32, #tpu.memory_space<vmem>>, vector<1x1x32xf32>
    %81 = vector.shape_cast %80 : vector<1x1x32xf32> to vector<1x32xf32>
    %c1_56 = arith.constant 1 : index
    %c1_57 = arith.constant 1 : index
    %c0_58 = arith.constant 0 : index
    %82 = vector.load %arg8[%c1_56, %c1_57, %c0_58] : memref<3x3x32xf32, #tpu.memory_space<vmem>>, vector<1x1x32xf32>
    %83 = vector.shape_cast %82 : vector<1x1x32xf32> to vector<1x32xf32>
    %c1_59 = arith.constant 1 : index
    %c2_60 = arith.constant 2 : index
    %c0_61 = arith.constant 0 : index
    %84 = vector.load %arg8[%c1_59, %c2_60, %c0_61] : memref<3x3x32xf32, #tpu.memory_space<vmem>>, vector<1x1x8xf32>
    %85 = vector.shape_cast %84 : vector<1x1x8xf32> to vector<1x8xf32>
    %c1_62 = arith.constant 1 : index
    %c0_63 = arith.constant 0 : index
    %c0_64 = arith.constant 0 : index
    %86 = vector.load %arg2[%c1_62, %c0_63, %c0_64] : memref<3x8x16xf32, #tpu.memory_space<vmem>>, vector<1x8x16xf32>
    %87 = vector.shape_cast %86 : vector<1x8x16xf32> to vector<8x16xf32>
    %cst_65 = arith.constant dense<0.000000e+00> : vector<1x16xf32>
    %88 = tpu.matmul %14, %87, %cst_65 {dimension_numbers = #tpu.dot_dimension_numbers<[1], [0], [0], [1], [0, 0, 1, 1], [], []>} : vector<1x8xf32>, vector<8x16xf32>, vector<1x16xf32> -> vector<1x16xf32>
    %89 = vector.extract_strided_slice %88 {offsets = [0, 0], sizes = [1, 8], strides = [1, 1]} : vector<1x16xf32> to vector<1x8xf32>
    %90 = vector.extract_strided_slice %88 {offsets = [0, 8], sizes = [1, 8], strides = [1, 1]} : vector<1x16xf32> to vector<1x8xf32>
    %91 = vector.extract_strided_slice %81 {offsets = [0, 0], sizes = [1, 24], strides = [1, 1]} : vector<1x32xf32> to vector<1x24xf32>
    %92 = tpu.concatenate %14, %91 in 1 : vector<1x8xf32>, vector<1x24xf32> -> vector<1x32xf32>
    %cst_66 = arith.constant 0.949999988 : f32
    %93 = vector.broadcast %cst_66 : f32 to vector<1x32xf32>
    %94 = arith.mulf %93, %83 : vector<1x32xf32>
    %95 = arith.addf %92, %94 : vector<1x32xf32>
    %c1_67 = arith.constant 1 : index
    %c0_68 = arith.constant 0 : index
    %c0_69 = arith.constant 0 : index
    %96 = vector.load %arg8[%c1_67, %c0_68, %c0_69] : memref<3x3x32xf32, #tpu.memory_space<vmem>>, vector<1x1x32xf32>
    %97 = vector.shape_cast %96 : vector<1x1x32xf32> to vector<1x32xf32>
    %98 = vector.shape_cast %92 : vector<1x32xf32> to vector<1x1x32xf32>
    tpu.vector_store %arg8[%c1_67, %c0_68, %c0_69], %98 {strides = array<i32>} : memref<3x3x32xf32, #tpu.memory_space<vmem>>, vector<1x1x32xf32>,
    %c1_70 = arith.constant 1 : index
    %c1_71 = arith.constant 1 : index
    %c0_72 = arith.constant 0 : index
    %99 = vector.load %arg8[%c1_70, %c1_71, %c0_72] : memref<3x3x32xf32, #tpu.memory_space<vmem>>, vector<1x1x32xf32>
    %100 = vector.shape_cast %99 : vector<1x1x32xf32> to vector<1x32xf32>
    %101 = vector.shape_cast %95 : vector<1x32xf32> to vector<1x1x32xf32>
    tpu.vector_store %arg8[%c1_70, %c1_71, %c0_72], %101 {strides = array<i32>} : memref<3x3x32xf32, #tpu.memory_space<vmem>>, vector<1x1x32xf32>,
    %c1_73 = arith.constant 1 : index
    %c0_74 = arith.constant 0 : index
    %c0_75 = arith.constant 0 : index
    %102 = vector.load %arg3[%c1_73, %c0_74, %c0_75] : memref<3x32x8xf32, #tpu.memory_space<vmem>>, vector<1x32x8xf32>
    %103 = vector.shape_cast %102 : vector<1x32x8xf32> to vector<32x8xf32>
    %cst_76 = arith.constant dense<0.000000e+00> : vector<1x8xf32>
    %104 = tpu.matmul %92, %103, %cst_76 {dimension_numbers = #tpu.dot_dimension_numbers<[1], [0], [0], [1], [0, 0, 1, 1], [], []>} : vector<1x32xf32>, vector<32x8xf32>, vector<1x8xf32> -> vector<1x8xf32>
    %c1_77 = arith.constant 1 : index
    %c0_78 = arith.constant 0 : index
    %c0_79 = arith.constant 0 : index
    %105 = vector.load %arg4[%c1_77, %c0_78, %c0_79] : memref<3x8x8xf32, #tpu.memory_space<vmem>>, vector<1x8x8xf32>
    %106 = vector.shape_cast %105 : vector<1x8x8xf32> to vector<8x8xf32>
    %cst_80 = arith.constant dense<0.000000e+00> : vector<1x8xf32>
    %107 = tpu.matmul %89, %106, %cst_80 {dimension_numbers = #tpu.dot_dimension_numbers<[1], [0], [0], [1], [0, 0, 1, 1], [], []>} : vector<1x8xf32>, vector<8x8xf32>, vector<1x8xf32> -> vector<1x8xf32>
    %c1_81 = arith.constant 1 : index
    %c0_82 = arith.constant 0 : index
    %c0_83 = arith.constant 0 : index
    %108 = vector.load %arg5[%c1_81, %c0_82, %c0_83] : memref<3x2x8xf32, #tpu.memory_space<vmem>>, vector<1x1x8xf32>
    %109 = vector.shape_cast %108 : vector<1x1x8xf32> to vector<1x8xf32>
    %c1_84 = arith.constant 1 : index
    %c1_85 = arith.constant 1 : index
    %c0_86 = arith.constant 0 : index
    %110 = vector.load %arg5[%c1_84, %c1_85, %c0_86] : memref<3x2x8xf32, #tpu.memory_space<vmem>>, vector<1x1x8xf32>
    %111 = vector.shape_cast %110 : vector<1x1x8xf32> to vector<1x8xf32>
    %c0_87 = arith.constant 0 : index
    %c2_88 = arith.constant 2 : index
    %c0_89 = arith.constant 0 : index
    %112 = vector.load %arg1[%c0_87, %c2_88, %c0_89] : memref<1x4x8xf32, #tpu.memory_space<vmem>>, vector<1x1x8xf32>
    %113 = vector.shape_cast %112 : vector<1x1x8xf32> to vector<1x8xf32>
    %cst_90 = arith.constant 0.000000e+00 : f32
    %114 = vector.broadcast %cst_90 : f32 to vector<1x8xf32>
    %115 = arith.subf %114, %107 : vector<1x8xf32>
    %cst_91 = arith.constant 0.000000e+00 : f32
    %116 = vector.broadcast %cst_91 : f32 to vector<1x8xf32>
    %117 = arith.maximumf %115, %116 : vector<1x8xf32>
    %118 = arith.addf %90, %117 : vector<1x8xf32>
    %119 = arith.addf %118, %109 : vector<1x8xf32>
    %cst_92 = arith.constant 1.000000e-01 : f32
    %120 = vector.broadcast %cst_92 : f32 to vector<1x8xf32>
    %121 = arith.mulf %120, %119 : vector<1x8xf32>
    %cst_93 = arith.constant -1.000000e-01 : f32
    %122 = vector.broadcast %cst_93 : f32 to vector<1x8xf32>
    %123 = arith.mulf %122, %14 : vector<1x8xf32>
    %cst_94 = arith.constant 0.000000e+00 : f32
    %124 = vector.broadcast %cst_94 : f32 to vector<1x8xf32>
    %125 = arith.maximumf %107, %124 : vector<1x8xf32>
    %126 = arith.addf %125, %111 : vector<1x8xf32>
    %cst_95 = arith.constant 1.000000e-01 : f32
    %127 = vector.broadcast %cst_95 : f32 to vector<1x8xf32>
    %128 = arith.mulf %127, %126 : vector<1x8xf32>
    %129 = arith.addf %123, %128 : vector<1x8xf32>
    %cst_96 = arith.constant 1.000000e+00 : f32
    %130 = vector.broadcast %cst_96 : f32 to vector<1x8xf32>
    %131 = arith.subf %130, %85 : vector<1x8xf32>
    %132 = arith.mulf %121, %131 : vector<1x8xf32>
    %cst_97 = arith.constant 5.000000e-02 : f32
    %133 = vector.broadcast %cst_97 : f32 to vector<1x8xf32>
    %134 = arith.addf %85, %133 : vector<1x8xf32>
    %cst_98 = arith.constant 1.000000e+00 : f32
    %135 = vector.broadcast %cst_98 : f32 to vector<1x8xf32>
    %136 = arith.addf %129, %135 : vector<1x8xf32>
    %137 = arith.mulf %134, %136 : vector<1x8xf32>
    %138 = arith.subf %132, %137 : vector<1x8xf32>
    %139 = arith.addf %138, %113 : vector<1x8xf32>
    %cst_99 = arith.constant 0.00999999977 : f32
    %140 = vector.broadcast %cst_99 : f32 to vector<1x8xf32>
    %141 = arith.mulf %140, %139 : vector<1x8xf32>
    %142 = arith.addf %85, %141 : vector<1x8xf32>
    %cst_100 = arith.constant 0.000000e+00 : f32
    %cst_101 = arith.constant 1.000000e+00 : f32
    %143 = vector.broadcast %cst_100 : f32 to vector<1x8xf32>
    %144 = arith.maximumf %143, %142 : vector<1x8xf32>
    %145 = vector.broadcast %cst_101 : f32 to vector<1x8xf32>
    %146 = arith.minimumf %145, %144 : vector<1x8xf32>
    %cst_102 = arith.constant 5.000000e-01 : f32
    %147 = vector.broadcast %cst_102 : f32 to vector<1x8xf32>
    %148 = arith.cmpf ogt, %146, %147 : vector<1x8xf32>
    %149 = arith.extui %148 : vector<1x8xi1> to vector<1x8xi32>
    %150 = arith.sitofp %149 : vector<1x8xi32> to vector<1x8xf32>
    %c1_103 = arith.constant 1 : index
    %c2_104 = arith.constant 2 : index
    %c0_105 = arith.constant 0 : index
    %151 = vector.load %arg8[%c1_103, %c2_104, %c0_105] : memref<3x3x32xf32, #tpu.memory_space<vmem>>, vector<1x1x8xf32>
    %152 = vector.shape_cast %151 : vector<1x1x8xf32> to vector<1x8xf32>
    %153 = vector.shape_cast %146 : vector<1x8xf32> to vector<1x1x8xf32>
    tpu.vector_store %arg8[%c1_103, %c2_104, %c0_105], %153 {strides = array<i32>} : memref<3x3x32xf32, #tpu.memory_space<vmem>>, vector<1x1x8xf32>,
    %154 = tpu.concatenate %146, %89, %104, %150 in 1 : vector<1x8xf32>, vector<1x8xf32>, vector<1x8xf32>, vector<1x8xf32> -> vector<1x32xf32>
    %c2_106 = arith.constant 2 : index
    %c0_107 = arith.constant 0 : index
    %c0_108 = arith.constant 0 : index
    %155 = vector.load %arg8[%c2_106, %c0_107, %c0_108] : memref<3x3x32xf32, #tpu.memory_space<vmem>>, vector<1x1x32xf32>
    %156 = vector.shape_cast %155 : vector<1x1x32xf32> to vector<1x32xf32>
    %c2_109 = arith.constant 2 : index
    %c1_110 = arith.constant 1 : index
    %c0_111 = arith.constant 0 : index
    %157 = vector.load %arg8[%c2_109, %c1_110, %c0_111] : memref<3x3x32xf32, #tpu.memory_space<vmem>>, vector<1x1x32xf32>
    %158 = vector.shape_cast %157 : vector<1x1x32xf32> to vector<1x32xf32>
    %c2_112 = arith.constant 2 : index
    %c2_113 = arith.constant 2 : index
    %c0_114 = arith.constant 0 : index
    %159 = vector.load %arg8[%c2_112, %c2_113, %c0_114] : memref<3x3x32xf32, #tpu.memory_space<vmem>>, vector<1x1x8xf32>
    %160 = vector.shape_cast %159 : vector<1x1x8xf32> to vector<1x8xf32>
    %c2_115 = arith.constant 2 : index
    %c0_116 = arith.constant 0 : index
    %c0_117 = arith.constant 0 : index
    %161 = vector.load %arg2[%c2_115, %c0_116, %c0_117] : memref<3x8x16xf32, #tpu.memory_space<vmem>>, vector<1x8x16xf32>
    %162 = vector.shape_cast %161 : vector<1x8x16xf32> to vector<8x16xf32>
    %cst_118 = arith.constant dense<0.000000e+00> : vector<1x16xf32>
    %163 = tpu.matmul %89, %162, %cst_118 {dimension_numbers = #tpu.dot_dimension_numbers<[1], [0], [0], [1], [0, 0, 1, 1], [], []>} : vector<1x8xf32>, vector<8x16xf32>, vector<1x16xf32> -> vector<1x16xf32>
    %164 = vector.extract_strided_slice %163 {offsets = [0, 0], sizes = [1, 8], strides = [1, 1]} : vector<1x16xf32> to vector<1x8xf32>
    %165 = vector.extract_strided_slice %163 {offsets = [0, 8], sizes = [1, 8], strides = [1, 1]} : vector<1x16xf32> to vector<1x8xf32>
    %166 = vector.extract_strided_slice %156 {offsets = [0, 0], sizes = [1, 24], strides = [1, 1]} : vector<1x32xf32> to vector<1x24xf32>
    %167 = tpu.concatenate %89, %166 in 1 : vector<1x8xf32>, vector<1x24xf32> -> vector<1x32xf32>
    %cst_119 = arith.constant 0.949999988 : f32
    %168 = vector.broadcast %cst_119 : f32 to vector<1x32xf32>
    %169 = arith.mulf %168, %158 : vector<1x32xf32>
    %170 = arith.addf %167, %169 : vector<1x32xf32>
    %c2_120 = arith.constant 2 : index
    %c0_121 = arith.constant 0 : index
    %c0_122 = arith.constant 0 : index
    %171 = vector.load %arg8[%c2_120, %c0_121, %c0_122] : memref<3x3x32xf32, #tpu.memory_space<vmem>>, vector<1x1x32xf32>
    %172 = vector.shape_cast %171 : vector<1x1x32xf32> to vector<1x32xf32>
    %173 = vector.shape_cast %167 : vector<1x32xf32> to vector<1x1x32xf32>
    tpu.vector_store %arg8[%c2_120, %c0_121, %c0_122], %173 {strides = array<i32>} : memref<3x3x32xf32, #tpu.memory_space<vmem>>, vector<1x1x32xf32>,
    %c2_123 = arith.constant 2 : index
    %c1_124 = arith.constant 1 : index
    %c0_125 = arith.constant 0 : index
    %174 = vector.load %arg8[%c2_123, %c1_124, %c0_125] : memref<3x3x32xf32, #tpu.memory_space<vmem>>, vector<1x1x32xf32>
    %175 = vector.shape_cast %174 : vector<1x1x32xf32> to vector<1x32xf32>
    %176 = vector.shape_cast %170 : vector<1x32xf32> to vector<1x1x32xf32>
    tpu.vector_store %arg8[%c2_123, %c1_124, %c0_125], %176 {strides = array<i32>} : memref<3x3x32xf32, #tpu.memory_space<vmem>>, vector<1x1x32xf32>,
    %c2_126 = arith.constant 2 : index
    %c0_127 = arith.constant 0 : index
    %c0_128 = arith.constant 0 : index
    %177 = vector.load %arg3[%c2_126, %c0_127, %c0_128] : memref<3x32x8xf32, #tpu.memory_space<vmem>>, vector<1x32x8xf32>
    %178 = vector.shape_cast %177 : vector<1x32x8xf32> to vector<32x8xf32>
    %cst_129 = arith.constant dense<0.000000e+00> : vector<1x8xf32>
    %179 = tpu.matmul %167, %178, %cst_129 {dimension_numbers = #tpu.dot_dimension_numbers<[1], [0], [0], [1], [0, 0, 1, 1], [], []>} : vector<1x32xf32>, vector<32x8xf32>, vector<1x8xf32> -> vector<1x8xf32>
    %c2_130 = arith.constant 2 : index
    %c0_131 = arith.constant 0 : index
    %c0_132 = arith.constant 0 : index
    %180 = vector.load %arg4[%c2_130, %c0_131, %c0_132] : memref<3x8x8xf32, #tpu.memory_space<vmem>>, vector<1x8x8xf32>
    %181 = vector.shape_cast %180 : vector<1x8x8xf32> to vector<8x8xf32>
    %cst_133 = arith.constant dense<0.000000e+00> : vector<1x8xf32>
    %182 = tpu.matmul %164, %181, %cst_133 {dimension_numbers = #tpu.dot_dimension_numbers<[1], [0], [0], [1], [0, 0, 1, 1], [], []>} : vector<1x8xf32>, vector<8x8xf32>, vector<1x8xf32> -> vector<1x8xf32>
    %c2_134 = arith.constant 2 : index
    %c0_135 = arith.constant 0 : index
    %c0_136 = arith.constant 0 : index
    %183 = vector.load %arg5[%c2_134, %c0_135, %c0_136] : memref<3x2x8xf32, #tpu.memory_space<vmem>>, vector<1x1x8xf32>
    %184 = vector.shape_cast %183 : vector<1x1x8xf32> to vector<1x8xf32>
    %c2_137 = arith.constant 2 : index
    %c1_138 = arith.constant 1 : index
    %c0_139 = arith.constant 0 : index
    %185 = vector.load %arg5[%c2_137, %c1_138, %c0_139] : memref<3x2x8xf32, #tpu.memory_space<vmem>>, vector<1x1x8xf32>
    %186 = vector.shape_cast %185 : vector<1x1x8xf32> to vector<1x8xf32>
    %c0_140 = arith.constant 0 : index
    %c3 = arith.constant 3 : index
    %c0_141 = arith.constant 0 : index
    %187 = vector.load %arg1[%c0_140, %c3, %c0_141] : memref<1x4x8xf32, #tpu.memory_space<vmem>>, vector<1x1x8xf32>
    %188 = vector.shape_cast %187 : vector<1x1x8xf32> to vector<1x8xf32>
    %cst_142 = arith.constant 0.000000e+00 : f32
    %189 = vector.broadcast %cst_142 : f32 to vector<1x8xf32>
    %190 = arith.subf %189, %182 : vector<1x8xf32>
    %cst_143 = arith.constant 0.000000e+00 : f32
    %191 = vector.broadcast %cst_143 : f32 to vector<1x8xf32>
    %192 = arith.maximumf %190, %191 : vector<1x8xf32>
    %193 = arith.addf %165, %192 : vector<1x8xf32>
    %194 = arith.addf %193, %184 : vector<1x8xf32>
    %cst_144 = arith.constant 1.000000e-01 : f32
    %195 = vector.broadcast %cst_144 : f32 to vector<1x8xf32>
    %196 = arith.mulf %195, %194 : vector<1x8xf32>
    %cst_145 = arith.constant -1.000000e-01 : f32
    %197 = vector.broadcast %cst_145 : f32 to vector<1x8xf32>
    %198 = arith.mulf %197, %89 : vector<1x8xf32>
    %cst_146 = arith.constant 0.000000e+00 : f32
    %199 = vector.broadcast %cst_146 : f32 to vector<1x8xf32>
    %200 = arith.maximumf %182, %199 : vector<1x8xf32>
    %201 = arith.addf %200, %186 : vector<1x8xf32>
    %cst_147 = arith.constant 1.000000e-01 : f32
    %202 = vector.broadcast %cst_147 : f32 to vector<1x8xf32>
    %203 = arith.mulf %202, %201 : vector<1x8xf32>
    %204 = arith.addf %198, %203 : vector<1x8xf32>
    %cst_148 = arith.constant 1.000000e+00 : f32
    %205 = vector.broadcast %cst_148 : f32 to vector<1x8xf32>
    %206 = arith.subf %205, %160 : vector<1x8xf32>
    %207 = arith.mulf %196, %206 : vector<1x8xf32>
    %cst_149 = arith.constant 5.000000e-02 : f32
    %208 = vector.broadcast %cst_149 : f32 to vector<1x8xf32>
    %209 = arith.addf %160, %208 : vector<1x8xf32>
    %cst_150 = arith.constant 1.000000e+00 : f32
    %210 = vector.broadcast %cst_150 : f32 to vector<1x8xf32>
    %211 = arith.addf %204, %210 : vector<1x8xf32>
    %212 = arith.mulf %209, %211 : vector<1x8xf32>
    %213 = arith.subf %207, %212 : vector<1x8xf32>
    %214 = arith.addf %213, %188 : vector<1x8xf32>
    %cst_151 = arith.constant 0.00999999977 : f32
    %215 = vector.broadcast %cst_151 : f32 to vector<1x8xf32>
    %216 = arith.mulf %215, %214 : vector<1x8xf32>
    %217 = arith.addf %160, %216 : vector<1x8xf32>
    %cst_152 = arith.constant 0.000000e+00 : f32
    %cst_153 = arith.constant 1.000000e+00 : f32
    %218 = vector.broadcast %cst_152 : f32 to vector<1x8xf32>
    %219 = arith.maximumf %218, %217 : vector<1x8xf32>
    %220 = vector.broadcast %cst_153 : f32 to vector<1x8xf32>
    %221 = arith.minimumf %220, %219 : vector<1x8xf32>
    %cst_154 = arith.constant 5.000000e-01 : f32
    %222 = vector.broadcast %cst_154 : f32 to vector<1x8xf32>
    %223 = arith.cmpf ogt, %221, %222 : vector<1x8xf32>
    %224 = arith.extui %223 : vector<1x8xi1> to vector<1x8xi32>
    %225 = arith.sitofp %224 : vector<1x8xi32> to vector<1x8xf32>
    %c2_155 = arith.constant 2 : index
    %c2_156 = arith.constant 2 : index
    %c0_157 = arith.constant 0 : index
    %226 = vector.load %arg8[%c2_155, %c2_156, %c0_157] : memref<3x3x32xf32, #tpu.memory_space<vmem>>, vector<1x1x8xf32>
    %227 = vector.shape_cast %226 : vector<1x1x8xf32> to vector<1x8xf32>
    %228 = vector.shape_cast %221 : vector<1x8xf32> to vector<1x1x8xf32>
    tpu.vector_store %arg8[%c2_155, %c2_156, %c0_157], %228 {strides = array<i32>} : memref<3x3x32xf32, #tpu.memory_space<vmem>>, vector<1x1x8xf32>,
    %229 = tpu.concatenate %221, %164, %179, %225 in 1 : vector<1x8xf32>, vector<1x8xf32>, vector<1x8xf32>, vector<1x8xf32> -> vector<1x32xf32>
    %230 = tpu.concatenate %79, %154, %229 in 1 : vector<1x32xf32>, vector<1x32xf32>, vector<1x32xf32> -> vector<1x96xf32>
    %c0_158 = arith.constant 0 : index
    %c0_159 = arith.constant 0 : index
    %c0_160 = arith.constant 0 : index
    %231 = vector.load %arg7[%c0_158, %c0_159, %c0_160] : memref<1x1x96xf32, #tpu.memory_space<vmem>>, vector<1x1x96xf32>
    %232 = vector.shape_cast %231 : vector<1x1x96xf32> to vector<1x96xf32>
    %233 = vector.shape_cast %230 : vector<1x96xf32> to vector<1x1x96xf32>
    tpu.vector_store %arg7[%c0_158, %c0_159, %c0_160], %233 {strides = array<i32>} : memref<1x1x96xf32, #tpu.memory_space<vmem>>, vector<1x1x96xf32>,
    return
  }
  func.func @transform_0(%arg0: i32) -> (i32, i32, i32) {
    %c0_i32 = arith.constant 0 : i32
    %c0_i32_0 = arith.constant 0 : i32
    %c0_i32_1 = arith.constant 0 : i32
    return %arg0, %c0_i32, %c0_i32_0 : i32, i32, i32
  }
  func.func @transform_1(%arg0: i32) -> (i32, i32, i32) {
    %c0_i32 = arith.constant 0 : i32
    %c0_i32_0 = arith.constant 0 : i32
    %c0_i32_1 = arith.constant 0 : i32
    %c0_i32_2 = arith.constant 0 : i32
    return %c0_i32, %c0_i32_0, %c0_i32_1 : i32, i32, i32
  }
  func.func @transform_2(%arg0: i32) -> (i32, i32, i32) {
    %c0_i32 = arith.constant 0 : i32
    %c0_i32_0 = arith.constant 0 : i32
    %c0_i32_1 = arith.constant 0 : i32
    %c0_i32_2 = arith.constant 0 : i32
    return %c0_i32, %c0_i32_0, %c0_i32_1 : i32, i32, i32
  }
  func.func @transform_3(%arg0: i32) -> (i32, i32, i32) {
    %c0_i32 = arith.constant 0 : i32
    %c0_i32_0 = arith.constant 0 : i32
    %c0_i32_1 = arith.constant 0 : i32
    %c0_i32_2 = arith.constant 0 : i32
    return %c0_i32, %c0_i32_0, %c0_i32_1 : i32, i32, i32
  }
  func.func @transform_4(%arg0: i32) -> (i32, i32, i32) {
    %c0_i32 = arith.constant 0 : i32
    %c0_i32_0 = arith.constant 0 : i32
    %c0_i32_1 = arith.constant 0 : i32
    %c0_i32_2 = arith.constant 0 : i32
    return %c0_i32, %c0_i32_0, %c0_i32_1 : i32, i32, i32
  }
  func.func @transform_5(%arg0: i32) -> (i32, i32, i32) {
    %c0_i32 = arith.constant 0 : i32
    %c0_i32_0 = arith.constant 0 : i32
    %c0_i32_1 = arith.constant 0 : i32
    %c0_i32_2 = arith.constant 0 : i32
    return %c0_i32, %c0_i32_0, %c0_i32_1 : i32, i32, i32
  }
  func.func @transform_6(%arg0: i32) -> (i32, i32, i32) {
    %c0_i32 = arith.constant 0 : i32
    %c0_i32_0 = arith.constant 0 : i32
    %c0_i32_1 = arith.constant 0 : i32
    return %arg0, %c0_i32, %c0_i32_0 : i32, i32, i32
  }
  func.func @transform_7(%arg0: i32) -> (i32, i32, i32) {
    %c0_i32 = arith.constant 0 : i32
    %c0_i32_0 = arith.constant 0 : i32
    %c0_i32_1 = arith.constant 0 : i32
    %c0_i32_2 = arith.constant 0 : i32
    return %c0_i32, %c0_i32_0, %c0_i32_1 : i32, i32, i32
  }
}

</mosaic_0001>

<bundles_post_ra>
// kernel: _her_impl.1
= control target key start
LH: loop header
LB: loop body
LE: loop exit
PB: predicated region body
PF: predicated region fallthrough
CT: control target
= control target key end

     0   :  { %s941_s24 = smov 0   ;;  %s1216_s0 = inlined_call_operand.vmem [shape: f32[8,4,8], index: 0, kind: input, shape index: {}]   ;;  %s1217_s1 = inlined_call_operand.vmem [shape: f32[3,8,16], index: 1, kind: input, shape index: {}]   ;;  %s1218_s2 = inlined_call_operand.vmem [shape: f32[3,32,8], index: 2, kind: input, shape index: {}]   ;;  %s1219_s3 = inlined_call_operand.vmem [shape: f32[3,8,8], index: 3, kind: input, shape index: {}]   ;;  %s1220_s4 = inlined_call_operand.vmem [shape: f32[3,2,8], index: 4, kind: input, shape index: {}]   ;;  %s1221_s5 = inlined_call_operand.vmem [shape: f32[3,3,32], index: 5, kind: input, shape index: {}, may-alias: {5,7}]   ;;  %s1222_s6 = inlined_call_operand.vmem [shape: f32[8,1,96], index: 6, kind: output, shape index: {0}]   ;;  %s1223_s7 = inlined_call_operand.vmem [shape: f32[3,3,32], index: 7, kind: output, shape index: {1}, may-alias: {5,7}]  }
   0x1 LB: > { %s817_s25 = sadd.s32 4294967295, %s892_s24   ;;  %p821_p0 = scmp.ge.s32.totalorder %s892_s24, 1  ;;  %s892_s24 = sphi %s941_s24, %s18_s24  }
   0x2   : > { %p234_p1 = scmp.lt.s32.totalorder %s892_s24, 9 }
   0x4   : > { %p235_p2 = pnand %p821_p0, %p234_p1 }
   0x5   : > { %p263_p3 = scmp.lt.s32.totalorder (!%p235_p2), %s817_s25, 7  ;;  %p823_p4 = scmp.ne.s32.totalorder (!%p235_p2), %s817_s25, 0 }
   0x6   : > { %238 = sbr.rel (%p235_p2) target bundleno = 1039 (0x40f), region = 44 }
   0xb   : > { %s949_s26 = scalar_select %p263_p3, %s817_s25, 7 }
   0xc   : > { %273 = sbr.rel (%p823_p4) target bundleno = 28 (0x1c), region = 48 }
   0xd   : > { %s822_s27 = sshll.u32 %s949_s26, 2  ;;  %s269_s30 = scalar_lea.vmem %s1222_s6, %s949_s26 }
   0xe   : > { %s959_s10 = scalar_lea.vmem %s1216_s0, %s822_s27 }
  0x11   : > { %v274_v0 = vld [vmem:[%s1221_s5] sm:$0x7]  ;;  %vm277_vm0 = vcmask 256000   ;;  %v275_v1 = vld [vmem:[%s1221_s5 + $0x4] sm:$0x7] }
  0x12   : > { %278 = vst.msk [vmem:[%s1223_s7] sm:$0x7] %vm277_vm0, %v274_v0 }
  0x19   : > { %v276_v2 = vld [vmem:[%s1221_s5 + $0x8] sm:$0x7] }
  0x1a   : > { %279 = vst.msk [vmem:[%s1223_s7 + $0x4] sm:$0x7] %vm277_vm0, %v275_v1 }
  0x1b   : > { %280 = vst.msk [vmem:[%s1223_s7 + $0x8] sm:$0x7] %vm277_vm0, %v276_v2 }
  0x1c PF: > { %v285_v3 = vld [vmem:[%s1217_s1] sm:$0xff]  ;;  %vm286_vm1 = vcmask 64512   ;;  %v838_v5 = vld [vmem:[%s1218_s2 + $0x38] sm:$0xff]  ;;  %s894_s9 = smov 8   ;;  %v837_v7 = vld [vmem:[%s1218_s2 + $0x30] sm:$0xff]  ;;  %vm317_vm2 = vcmask 253952  }
  0x1d   : > { %v983_v4 = vld [vmem:[%s959_s10] sm:$0x1]  ;;  %305 = vmatpush.msra.mxu0 %v285_v3  ;;  %v831_v9 = vld [vmem:[%s1217_s1 + $0x8] sm:$0xff]  ;;  %v323_v14 = vld [vmem:[%s1218_s2 + $0x18] sm:$0xff]  ;;  %vm324_vm3 = vcmask 261120   ;;  %s896_s11 = smov 16  }
  0x1e   : > { %824 = vmatmul.msk.f32.vlgmr.msra.gmra.mxu0 %vm286_vm1, %v983_v4  ;;  %v348_v8 = vld [vmem:[%s1219_s3] sm:$0xff]  ;;  %v836_v10 = vld [vmem:[%s1218_s2 + $0x28] sm:$0xff]  ;;  %462 = vmatpush.msra.mxu3 %v831_v9  ;;  %v322_v15 = vld [vmem:[%s1218_s2 + $0x10] sm:$0xff]  ;;  %vm423_vm4 = vcmask 57344   ;;  %vm437_vm8 = vcmask 130048   ;;  %vm439_vm9 = vcmask 195584  }
  0x1f   : > { %496 = vmatpush.msrb.mxu0 %v838_v5  ;;  %367 = vmatpush.msra.mxu2 %v348_v8  ;;  %v835_v11 = vld [vmem:[%s1218_s2 + $0x20] sm:$0xff]  ;;  %v321_v16 = vld [vmem:[%s1218_s2 + $0x8] sm:$0xff]  ;;  %v849_v24 = vld [vmem:[%s1217_s1 + $0x10] sm:$0xff]  ;;  %s899_s18 = smov 32   ;;  %s900_s19 = smov 64   ;;  %vm760_vm10 = vcmask 523264  }
  0x20   : > { %v282_v12 = vld [vmem:[%s1223_s7] sm:$0x1]  ;;  %340 = vmatpush.msra.mxu1 %v323_v14  ;;  %617 = vmatpush.msrb.mxu3 %v849_v24  ;;  %v283_v25 = vld [vmem:[%s1223_s7 + $0x1] sm:$0x1]  ;;  %v856_v30 = vld [vmem:[%s1218_s2 + $0x58] sm:$0xff]  ;;  %vm762_vm11 = vcmask 778240  }
  0x21   : > { %v828_v6 = vld [vmem:[%s1223_s7 + $0x4] sm:$0x1]  ;;  %497 = vmatpush.msrb.mxu0 %v837_v7  ;;  %v829_v17 = vld [vmem:[%s1223_s7 + $0x5] sm:$0x1]  ;;  %v315_v26 = vmul.f32 0.95, %v283_v25 }
  0x22   : > { %468 = vrot.lane.b32.xlu0 %v828_v6, %s894_s9  ;;  %v846_v13 = vld [vmem:[%s1223_s7 + $0x8] sm:$0x1]  ;;  %341 = vmatpush.msra.mxu1 %v322_v15  ;;  %v472_v19 = vmul.f32 0.95, %v829_v17  ;;  %v320_v23 = vld [vmem:[%s1218_s2] sm:$0xff]  ;;  %v855_v31 = vld [vmem:[%s1218_s2 + $0x50] sm:$0xff] }
  0x23   : > { %498 = vmatpush.msrb.mxu0 %v836_v10  ;;  %623 = vrot.lane.b32.xlu1 %v846_v13, %s894_s9  ;;  %v840_v32 = vld [vmem:[%s1219_s3 + $0x8] sm:$0xff]  ;;  %v853_v34 = vld [vmem:[%s1218_s2 + $0x40] sm:$0xff]  ;;  %v858_v41 = vld [vmem:[%s1219_s3 + $0x10] sm:$0xff] }
  0x24   : > { %342 = vmatpush.msra.mxu1 %v321_v16  ;;  %v854_v33 = vld [vmem:[%s1218_s2 + $0x48] sm:$0xff]  ;;  %524 = vmatpush.msrb.mxu2 %v840_v32  ;;  %v860_v42 = vld [vmem:[%s1220_s4 + $0x4] sm:$0x1]  ;;  %v842_v43 = vld [vmem:[%s1220_s4 + $0x2] sm:$0x1] }
  0x25   : > { %499 = vmatpush.msrb.mxu0 %v835_v11  ;;  %v847_v35 = vld [vmem:[%s1223_s7 + $0x9] sm:$0x1]  ;;  %541 = vrot.lane.b32.xlu2 %v842_v43, %s894_s9  ;;  %v843_v46 = vld [vmem:[%s1220_s4 + $0x3] sm:$0x1]  ;;  %v1122_v52 = vld [vmem:[%s1223_s7 + $0x6] sm:$0x1] }
  0x26   : > { %343 = vmatpush.msra.mxu1 %v320_v23  ;;  %v627_v37 = vmul.f32 0.95, %v847_v35  ;;  %v557_v56 = vadd.f32 0.05, %v1122_v52  ;;  %v551_v58 = vsub.f32 1.0, %v1122_v52 }
  0x27   : > { %679 = vmatpush.msra.mxu0 %v858_v41  ;;  %v687_v60 = vld [vmem:[%s959_s10 + $0x3] sm:$0x1]  ;;  %v1135_v61 = vld [vmem:[%s1223_s7 + $0x2] sm:$0x1]  ;;  %v861_v1 = vld [vmem:[%s1220_s4 + $0x5] sm:$0x1] }
  0x28   : > { %651 = vmatpush.msrb.mxu1 %v856_v30  ;;  %v393_v62 = vsub.f32 1.0, %v1135_v61  ;;  %v1147_v7 = vld [vmem:[%s1223_s7 + $0xa] sm:$0x1]  ;;  %v373_v13 = vld [vmem:[%s1220_s4 + $0x1] sm:$0x1] }
  0x29   : > { %v706_v15 = vsub.f32 1.0, %v1147_v7  ;;  %v399_v25 = vadd.f32 0.05, %v1135_v61 }
  0x2a   : > { %311 = vrot.lane.b32.xlu0 %v282_v12, %s894_s9  ;;  %652 = vmatpush.msrb.mxu1 %v855_v31  ;;  %v712_v12 = vadd.f32 0.05, %v1147_v7 }
  0x2c   : > { %653 = vmatpush.msrb.mxu1 %v854_v33 }
  0x2e   : > { %654 = vmatpush.msrb.mxu1 %v853_v34 }
  0x32   : > { %696 = vrot.lane.b32.xlu0 %v860_v42, %s894_s9 }
  0x94   : > { %v469_v18 = vpop.permute.xlu0 %468 }
  0x95   : > { %v624_v36 = vpop.permute.xlu1 %623 }
  0x9b   : > { %v1029_v20 = vpop.f32.mrf.mxu0 }
  0x9c   : > { %826 = vmatmul.msk.f32.vlgmr.msra.gmra.mxu2 %vm286_vm1, %v1029_v20  ;;  %832 = vmatmul.msk.f32.vlgmr.msra.gmra.mxu3 %vm286_vm1, %v1029_v20  ;;  %v471_v21 = vsel %vm286_vm1, %v1029_v20, %v469_v18  ;;  %v312_v27 = vpop.permute.xlu0 %311  ;;  %v546_v53 = vmul.f32 -0.1, %v1029_v20  ;;  %v388_v18 = vmul.f32 -0.1, %v983_v4 }
  0x9d   : > { %v473_v22 = vadd.f32 %v472_v19, %v471_v21  ;;  %833 = vst.msk [vmem:[%s1223_s7 + $0x4] sm:$0x1] %vm317_vm2, %v471_v21  ;;  %839 = vmatmul.msk.f32.vlgmr.msrb.gmra.mxu0 %vm324_vm3, %v471_v21  ;;  %v314_v28 = vsel %vm286_vm1, %v983_v4, %v312_v27  ;;  %v372_v27 = vld [vmem:[%s1220_s4] sm:$0x1]  ;;  %v374_v4 = vld [vmem:[%s959_s10 + $0x1] sm:$0x1] }
  0x9e   : > { %v316_v29 = vadd.f32 %v315_v26, %v314_v28  ;;  %318 = vst.msk [vmem:[%s1223_s7] sm:$0x1] %vm317_vm2, %v314_v28  ;;  %825 = vmatmul.msk.f32.vlgmr.msra.gmra.mxu1 %vm324_vm3, %v314_v28 }
  0x9f   : > { %834 = vst.msk [vmem:[%s1223_s7 + $0x5] sm:$0x1] %vm317_vm2, %v473_v22  ;;  %v532_v22 = vld [vmem:[%s959_s10 + $0x2] sm:$0x1]  ;;  %s895_s10 = smov 120  }
  0xa0   : > { %319 = vst.msk [vmem:[%s1223_s7 + $0x1] sm:$0x1] %vm317_vm2, %v316_v29  ;;  %v542_v29 = vpop.permute.xlu2 %541 }
  0xa4   : > { %v697_v33 = vpop.permute.xlu0 %696 }
 0x11a   : > { %v1139_v63 = vpop.f32.mrf.mxu0 }
 0x11f   : > { %v1084_v38 = vpop.f32.mrf.mxu3  ;;  %v369_v44 = vpop.f32.mrf.mxu2 }
 0x120   : > { %841 = vmatmul.msk.f32.vlgmr.msrb.gmra.mxu2 %vm286_vm1, %v1084_v38  ;;  %850 = vmatmul.msk.f32.vlgmr.msrb.gmra.mxu3 %vm286_vm1, %v1084_v38  ;;  %v626_v39 = vsel %vm286_vm1, %v1084_v38, %v624_v36  ;;  %v701_v8 = vmul.f32 -0.1, %v1084_v38  ;;  %v389_v10 = vmax.f32 %v369_v44, 0.0  ;;  %v375_v19 = vsub.f32 0.0, %v369_v44 }
 0x121   : > { %v628_v40 = vadd.f32 %v627_v37, %v626_v39  ;;  %851 = vst.msk [vmem:[%s1223_s7 + $0x8] sm:$0x1] %vm317_vm2, %v626_v39  ;;  %857 = vmatmul.msk.f32.vlgmr.msrb.gmra.mxu1 %vm324_vm3, %v626_v39 }
 0x122   : > { %v390_v16 = vadd.f32 %v389_v10, %v373_v13  ;;  %v376_v23 = vmax.f32 %v375_v19, 0.0 }
 0x123   : > { %852 = vst.msk [vmem:[%s1223_s7 + $0x9] sm:$0x1] %vm317_vm2, %v628_v40 }
 0x124   : > { %v391_v21 = vmul.f32 0.1, %v390_v16 }
 0x126   : > { %v392_v24 = vadd.f32 %v391_v21, %v388_v18 }
 0x128   : > { %v400_v26 = vadd.f32 1.0, %v392_v24 }
 0x12a   : > { %v401_v28 = vmul.f32 %v400_v26, %v399_v25 }
 0x1a3   : > { %v526_v45 = vpop.f32.mrf.mxu2  ;;  %v1115_v47 = vpop.f32.mrf.mxu3 }
 0x1a4   : > { %v533_v48 = vsub.f32 0.0, %v526_v45  ;;  %v547_v49 = vmax.f32 %v526_v45, 0.0  ;;  %859 = vmatmul.msk.f32.vlgmr.msra.gmra.mxu0 %vm286_vm1, %v1115_v47 }
 0x1a6   : > { %v534_v50 = vmax.f32 %v533_v48, 0.0  ;;  %v548_v51 = vadd.f32 %v843_v46, %v547_v49 }
 0x1a8   : > { %v549_v54 = vmul.f32 0.1, %v548_v51  ;;  %536 = vrot.lane.b32.xlu1 %v534_v50, %s894_s9 }
 0x1aa   : > { %v550_v55 = vadd.f32 %v549_v54, %v546_v53 }
 0x1ac   : > { %v558_v57 = vadd.f32 1.0, %v550_v55 }
 0x1ae   : > { %v559_v59 = vmul.f32 %v558_v57, %v557_v56 }
 0x1b0   : > { %561 = vrot.lane.b32.xlu0 %v559_v59, %s894_s9  ;;  %553 = vrot.lane.b32.xlu1 %v551_v58, %s894_s9 }
 0x1b8   : > { %721 = vrot.lane.b32.xlu0 %v687_v60, %s894_s9  ;;  %v345_v60 = vpop.f32.mrf.mxu1 }
 0x1c0   : > { %395 = vrot.lane.b32.xlu0 %v393_v62, %s894_s9 }
 0x21a   : > { %v537_v30 = vpop.permute.xlu1 %536 }
 0x21b   : > { %v539_v32 = vadd.f32 %v537_v30, %v1084_v38 }
 0x21d   : > { %v544_v34 = vadd.f32 %v542_v29, %v539_v32 }
 0x21f   : > { %v545_v37 = vmul.f32 0.1, %v544_v34 }
 0x221   : > { %v681_v0 = vpop.f32.mrf.mxu0 }
 0x222   : > { %v688_v2 = vsub.f32 0.0, %v681_v0  ;;  %v702_v3 = vmax.f32 %v681_v0, 0.0  ;;  %v554_v35 = vpop.permute.xlu1 %553  ;;  %v562_v40 = vpop.permute.xlu0 %561 }
 0x223   : > { %v556_v39 = vmul.f32 %v554_v35, %v545_v37 }
 0x224   : > { %v689_v5 = vmax.f32 %v688_v2, 0.0  ;;  %v703_v6 = vadd.f32 %v861_v1, %v702_v3 }
 0x225   : > { %v564_v41 = vsub.f32 %v556_v39, %v562_v40 }
 0x226   : > { %v704_v9 = vmul.f32 0.1, %v703_v6  ;;  %691 = vrot.lane.b32.xlu2 %v689_v5, %s894_s9 }
 0x228   : > { %v705_v11 = vadd.f32 %v704_v9, %v701_v8  ;;  %v656_v8 = vpop.f32.mrf.mxu1 }
 0x22a   : > { %v713_v14 = vadd.f32 1.0, %v705_v11  ;;  %v722_v51 = vpop.permute.xlu0 %721 }
 0x22c   : > { %v714_v17 = vmul.f32 %v713_v14, %v712_v12 }
 0x22e   : > { %708 = vrot.lane.b32.xlu2 %v706_v15, %s894_s9  ;;  %716 = vrot.lane.b32.xlu1 %v714_v17, %s894_s9 }
 0x232   : > { %v396_v62 = vpop.permute.xlu0 %395 }
 0x236   : > { %566 = vrot.lane.b32.xlu2 %v532_v22, %s894_s9  ;;  %378 = vrot.lane.b32.xlu1 %v376_v23, %s894_s9 }
 0x23e   : > { %403 = vrot.lane.b32.xlu1 %v401_v28, %s894_s9  ;;  %383 = vrot.lane.b32.xlu2 %v372_v27, %s894_s9 }
 0x246   : > { %408 = vrot.lane.b32.xlu2 %v374_v4, %s894_s9 }
 0x280   : > { %v692_v31 = vpop.permute.xlu2 %691 }
 0x281   : > { %v694_v45 = vadd.f32 %v692_v31, %v1115_v47 }
 0x283   : > { %v699_v46 = vadd.f32 %v697_v33, %v694_v45 }
 0x285   : > { %v700_v48 = vmul.f32 0.1, %v699_v46 }
 0x288   : > { %v709_v36 = vpop.permute.xlu2 %708 }
 0x289   : > { %v711_v49 = vmul.f32 %v709_v36, %v700_v48 }
 0x290   : > { %v567_v42 = vpop.permute.xlu2 %566 }
 0x291   : > { %v569_v43 = vadd.f32 %v567_v42, %v564_v41 }
 0x293   : > { %v570_v44 = vmul.f32 0.01, %v569_v43 }
 0x295   : > { %572 = vrot.lane.b32.xlu0 %v570_v44, %s895_s10 }
 0x298   : > { %v384_v56 = vpop.permute.xlu2 %383 }
 0x29d   : > { %582 = vrot.lane.b32.xlu0 %v1084_v38, %s894_s9 }
 0x2a0   : > { %v717_v50 = vpop.permute.xlu1 %716  ;;  %v409_v2 = vpop.permute.xlu2 %408 }
 0x2a1   : > { %v719_v53 = vsub.f32 %v711_v49, %v717_v50 }
 0x2a3   : > { %v724_v54 = vadd.f32 %v722_v51, %v719_v53 }
 0x2a5   : > { %v725_v55 = vmul.f32 0.01, %v724_v54 }
 0x2a7   : > { %727 = vrot.lane.b32.xlu1 %v725_v55, %s895_s10 }
 0x2a8   : > { %v379_v57 = vpop.permute.xlu1 %378 }
 0x2a9   : > { %v381_v58 = vadd.f32 %v379_v57, %v1029_v20 }
 0x2ab   : > { %v386_v59 = vadd.f32 %v384_v56, %v381_v58 }
 0x2ad   : > { %v387_v0 = vmul.f32 0.1, %v386_v59 }
 0x2af   : > { %v398_v1 = vmul.f32 %v396_v62, %v387_v0  ;;  %586 = vrot.lane.b32.xlu1 %v1139_v63, %s896_s11 }
 0x2b0   : > { %v404_v38 = vpop.permute.xlu1 %403 }
 0x2b1   : > { %v406_v3 = vsub.f32 %v398_v1, %v404_v38 }
 0x2b3   : > { %v411_v5 = vadd.f32 %v409_v2, %v406_v3 }
 0x2b5   : > { %v412_v6 = vmul.f32 0.01, %v411_v5 }
 0x2b7   : > { %741 = vrot.lane.b32.xlu1 %v656_v8, %s896_s11  ;;  %414 = vrot.lane.b32.xlu2 %v412_v6, %s895_s10 }
 0x2bf   : > { %737 = vrot.lane.b32.xlu2 %v1115_v47, %s894_s9  ;;  %v897_v47 = vmov 0.0  }
 0x2c7   : > { %425 = vrot.lane.b32.xlu2 %v1029_v20, %s894_s9  ;;  %s898_s9 = smov 24  }
 0x307   : > { %v573_v9 = vpop.permute.xlu0 %572 }
 0x308   : > { %v575_v10 = vadd.f32 %v1122_v52, %v573_v9 }
 0x30a   : > { %v576_v11 = vmax.f32 %v575_v10, 0.0 }
 0x30c   : > { %v577_v63 = vmin.f32 %v576_v11, 1.0 }
 0x30e   : > { %845 = vst.msk [vmem:[%s1223_s7 + $0x6] sm:$0x1] %vm423_vm4, %v577_v63  ;;  %vm578_vm6 = vcmp.gt.f32.partialorder %v577_v63, 0.5 }
 0x30f   : > { %v583_v23 = vpop.permute.xlu0 %582 }
 0x310   : > { %v593_v26 = vsel %vm286_vm1, %v577_v63, %v583_v23 }
 0x311   : > { %v415_v12 = vpop.permute.xlu2 %414 }
 0x312   : > { %v417_v13 = vadd.f32 %v415_v12, %v1135_v61  ;;  %v844_v61 = vsel %vm578_vm6, 1.0, %v897_v47 }
 0x314   : > { %v418_v14 = vmax.f32 %v417_v13, 0.0 }
 0x316   : > { %v419_v15 = vmin.f32 %v418_v14, 1.0 }
 0x318   : > { %424 = vst.msk [vmem:[%s1223_s7 + $0x2] sm:$0x1] %vm423_vm4, %v419_v15  ;;  %vm420_vm5 = vcmp.gt.f32.partialorder %v419_v15, 0.5 }
 0x319   : > { %v728_v20 = vpop.permute.xlu1 %727  ;;  %v827_v52 = vsel %vm420_vm5, 1.0, %v897_v47 }
 0x31a   : > { %v730_v16 = vadd.f32 %v1147_v7, %v728_v20  ;;  %433 = vrot.lane.b32.xlu1 %v827_v52, %s898_s9  ;;  %v738_v7 = vpop.permute.xlu2 %737 }
 0x31c   : > { %v731_v17 = vmax.f32 %v730_v16, 0.0 }
 0x31e   : > { %v732_v18 = vmin.f32 %v731_v17, 1.0 }
 0x320   : > { %863 = vst.msk [vmem:[%s1223_s7 + $0xa] sm:$0x1] %vm423_vm4, %v732_v18  ;;  %vm733_vm7 = vcmp.gt.f32.partialorder %v732_v18, 0.5  ;;  %v748_v27 = vsel %vm286_vm1, %v732_v18, %v738_v7 }
 0x321   : > { %v862_v19 = vsel %vm733_vm7, 1.0, %v897_v47  ;;  %v587_v22 = vpop.permute.xlu1 %586 }
 0x322   : > { %v881_v21 = vpack.i.bf16 %v862_v19, %v844_v61  ;;  %v594_v29 = vsel %vm437_vm8, %v593_v26, %v587_v22  ;;  %v426_v33 = vpop.permute.xlu2 %425 }
 0x323   : > { %v436_v34 = vsel %vm286_vm1, %v419_v15, %v426_v33 }
 0x324   : > { %882 = vrot.lane.b32.xlu0 %v881_v21, %s898_s9 }
 0x329   : > { %v742_v24 = vpop.permute.xlu1 %741 }
 0x32a   : > { %v749_v30 = vsel %vm437_vm8, %v748_v27, %v742_v24 }
 0x32c   : > { %429 = vrot.lane.b32.xlu0 %v345_v60, %s896_s11 }
 0x38c   : > { %v434_v36 = vpop.permute.xlu1 %433 }
 0x396   : > { %v883_v25 = vpop.permute.xlu0 %882 }
 0x397   : > { %v885_v28 = vunpack.i.h.bf16 %v883_v25  ;;  %v884_v4 = vunpack.i.l.bf16 %v883_v25 }
 0x399   : > { %v595_v31 = vsel %vm439_vm9, %v594_v29, %v884_v4  ;;  %v750_v32 = vsel %vm439_vm9, %v749_v30, %v885_v28 }
 0x39a   : > { %752 = vrot.lane.b32.xlu2 %v595_v31, %s899_s18  ;;  %756 = vrot.lane.b32.xlu0 %v750_v32, %s900_s19 }
 0x39e   : > { %v430_v35 = vpop.permute.xlu0 %429 }
 0x39f   : > { %v438_v37 = vsel %vm437_vm8, %v436_v34, %v430_v35 }
 0x3a0   : > { %v440_v39 = vsel %vm439_vm9, %v438_v37, %v434_v36 }
 0x3f4   : > { %v753_v40 = vpop.permute.xlu2 %752 }
 0x3f5   : > { %v759_v41 = vsel %vm324_vm3, %v440_v39, %v753_v40 }
 0x40c   : > { %v757_v42 = vpop.permute.xlu0 %756 }
 0x40d   : > { %v761_v43 = vsel %vm760_vm10, %v759_v41, %v757_v42 }
 0x40e   : > { %763 = vst.msk [vmem:[%s269_s30] sm:$0x1] %vm762_vm11, %v761_v43 }
 0x40f PF: > { %s18_s24 = sadd.s32 1, %s892_s24  }
 0x410   : > { %p15_p5 = scmp.ge.s32.totalorder %s18_s24, 10  }
 0x412   :  { %17 = sbr.rel (!%p15_p5) target bundleno = 1 (0x1), region = 96 }

</bundles_post_ra>
